<compile_context>
chip_gen: v7x
topology: tpu7x:2x2x1
jax: 0.10.0
libtpu: 0.0.40
codegen_flags: <defaults>
</compile_context>

<pallas_src>
import jax
import jax.numpy as jnp
from jax.experimental import pallas as pl
from jax.experimental.pallas import tpu as pltpu


def gate_activation_kernel(g_ref, y_ref, o_ref):
    g = g_ref[...]
    y = y_ref[...]
    g_clamp = jnp.maximum(g, jnp.zeros_like(g))            # relu(G)
    o_ref[...] = jnp.maximum(jnp.minimum(y, g_clamp), -g_clamp)


def _round_up(x, m):
    return ((x + m - 1) // m) * m


def _pick_tile(dim, unit, max_tile):
    """Largest multiple of `unit` that divides `dim` and is <= max_tile.
    Callers pad `dim` to a multiple of `unit`, so the full-dim fallback is
    only a safety net."""
    if dim % unit != 0:
        return dim
    t = min(max_tile, dim)
    t = max(unit, (t // unit) * unit)
    while dim % t != 0:
        t -= unit
    return t


def _vmem_budget():
    """Per-generation VMEM limit and per-block byte budget.

    v7x has 64 MiB VMEM per TensorCore -> cap the scoped limit at 48 MiB and
    target ~4 MiB blocks (6 double-buffered blocks = 24 MiB).
    v5e/v6e have 128 MiB -> 64 MiB limit and ~8 MiB blocks.
    On any failure, fall back to the conservative (v7x-safe) setting.
    """
    try:
        info = pltpu.get_tpu_info()
        vmem_bytes = getattr(info, "vmem_capacity_bytes", 64 * 1024 * 1024)
    except Exception:
        vmem_bytes = 64 * 1024 * 1024
    if vmem_bytes > 64 * 1024 * 1024:          # v5e / v6e
        return 64 * 1024 * 1024, 8 * 1024 * 1024
    return 48 * 1024 * 1024, 4 * 1024 * 1024    # v7x (or unknown -> safe)


def gate_activation_forward(X, num_outputs):
    B = X.shape[0]
    N = num_outputs
    assert X.shape == (B, 2 * N), f"expected X of shape ({B}, {2 * N}), got {X.shape}"

    itemsize = jnp.dtype(X.dtype).itemsize
    # Sublane granularity: 32 rows for 8-bit, 16 for 16-bit, 8 for 32-bit dtypes.
    sub = 32 if itemsize == 1 else (16 if itemsize == 2 else 8)

    # Pad to lane/sublane-aligned sizes so stores stay unmasked full-width vst
    # and tile picking never degenerates (one-time copy only on unaligned shapes).
    Np = _round_up(N, 128)
    Bp = _round_up(B, sub)
    if Np != N or Bp != B:
        X3 = X.reshape(B, 2, N)
        X3 = jnp.pad(X3, ((0, Bp - B), (0, 0), (0, Np - N)))
        Xp = X3.reshape(Bp, 2 * Np)
    else:
        Xp = X

    vmem_limit, block_budget = _vmem_budget()
    max_elems = max(sub * 128, block_budget // itemsize)

    # Lane-dense first: big Nt (multiple of 128), then spend the remaining
    # block budget on the batch (sublane) axis.
    Nt = _pick_tile(Np, 128, min(Np, 2048))
    max_bt = max(sub, ((max_elems // Nt) // sub) * sub)
    Bt = _pick_tile(Bp, sub, min(Bp, max_bt))

    grid_b = Bp // Bt
    grid_n = Np // Nt
    off = Np // Nt  # block-index offset of the Y half inside [Bp, 2*Np]

    # Put the axis with more blocks first so the sharded (outer) parallel axis
    # actually has >= 2 blocks -> both v7x TensorCores stream. No-op on v5e/v6e.
    if grid_n >= grid_b:
        grid = (grid_n, grid_b)
        g_map = lambda j, i: (i, j)
        y_map = lambda j, i, _o=off: (i, j + _o)
        o_map = lambda j, i: (i, j)
    else:
        grid = (grid_b, grid_n)
        g_map = lambda i, j: (i, j)
        y_map = lambda i, j, _o=off: (i, j + _o)
        o_map = lambda i, j: (i, j)

    out = pl.pallas_call(
        gate_activation_kernel,
        out_shape=jax.ShapeDtypeStruct((Bp, Np), X.dtype),
        grid_spec=pltpu.PrefetchScalarGridSpec(
            num_scalar_prefetch=0,
            grid=grid,
            in_specs=[
                pl.BlockSpec((Bt, Nt), g_map),   # G half: columns [0, Np)
                pl.BlockSpec((Bt, Nt), y_map),   # Y half: columns [Np, 2*Np)
            ],
            out_specs=pl.BlockSpec((Bt, Nt), o_map),
        ),
        compiler_params=pltpu.CompilerParams(
            dimension_semantics=("parallel", "parallel"),
            vmem_limit_bytes=vmem_limit,
        ),
    )(Xp, Xp)   # same HBM array feeds both halves; disjoint tiles -> no extra traffic

    if Np != N or Bp != B:
        out = out[:B, :N]
    return out


def reference_forward(X, num_outputs):
    B = X.shape[0]
    X1 = X.reshape(B, 2, num_outputs)
    G = X1[:, 0, :]
    Y = X1[:, 1, :]
    G_clamp = jnp.maximum(G, 0.0)
    return jnp.maximum(jnp.minimum(Y, G_clamp), -G_clamp)


if __name__ == "__main__":
    # Small, lane-aligned demo shapes consistent with the module:
    # X is [batch, 2 * num_outputs].
    num_outputs = 256
    B = 16
    key = jax.random.PRNGKey(0)
    X = jax.random.normal(key, (B, 2 * num_outputs), dtype=jnp.float32)

    out = gate_activation_forward(X, num_outputs)
    out = jax.block_until_ready(out)

    ref = reference_forward(X, num_outputs)
    assert out.shape == (B, num_outputs)
    assert jnp.allclose(out, ref, atol=1e-6, rtol=1e-6)

    # Also exercise the padded (unaligned) path for robustness.
    num_outputs2, B2 = 200, 10   # N not multiple of 128, B not multiple of 8
    X2 = jax.random.normal(jax.random.PRNGKey(1), (B2, 2 * num_outputs2),
                           dtype=jnp.float32)
    out2 = jax.block_until_ready(gate_activation_forward(X2, num_outputs2))
    assert out2.shape == (B2, num_outputs2)
    assert jnp.allclose(out2, reference_forward(X2, num_outputs2),
                        atol=1e-6, rtol=1e-6)

    print("KERNEL_OK")
</pallas_src>

<mosaic_0001>
module attributes {stable_mosaic.version = 11 : i64} {
  func.func @gate_activation_kernel(%arg0: i32, %arg1: i32, %arg2: memref<16x256xf32, #tpu.memory_space<vmem>>, %arg3: memref<16x256xf32, #tpu.memory_space<vmem>>, %arg4: memref<16x256xf32, #tpu.memory_space<vmem>>) attributes {dimension_semantics = [#tpu.dimension_semantics<parallel>, #tpu.dimension_semantics<parallel>], iteration_bounds = array<i64: 1, 1>, scalar_prefetch = 0 : i64, scratch_operands = 0 : i64, tpu.core_type = #tpu.core_type<tc>, window_params = [{transform_indices = @transform_0, window_bounds = array<i64: 16, 256>}, {transform_indices = @transform_1, window_bounds = array<i64: 16, 256>}, {transform_indices = @transform_2, window_bounds = array<i64: 16, 256>}]} {
    %c0 = arith.constant 0 : index
    %c0_0 = arith.constant 0 : index
    %0 = vector.load %arg2[%c0, %c0_0] : memref<16x256xf32, #tpu.memory_space<vmem>>, vector<16x256xf32>
    %c0_1 = arith.constant 0 : index
    %c0_2 = arith.constant 0 : index
    %1 = vector.load %arg3[%c0_1, %c0_2] : memref<16x256xf32, #tpu.memory_space<vmem>>, vector<16x256xf32>
    %cst = arith.constant 0.000000e+00 : f32
    %2 = vector.broadcast %cst : f32 to vector<16x256xf32>
    %3 = arith.maximumf %0, %2 : vector<16x256xf32>
    %4 = arith.minimumf %1, %3 : vector<16x256xf32>
    %cst_3 = arith.constant 0.000000e+00 : f32
    %5 = vector.broadcast %cst_3 : f32 to vector<16x256xf32>
    %6 = arith.subf %5, %3 : vector<16x256xf32>
    %7 = arith.maximumf %4, %6 : vector<16x256xf32>
    %c0_4 = arith.constant 0 : index
    %c0_5 = arith.constant 0 : index
    %8 = vector.load %arg4[%c0_4, %c0_5] : memref<16x256xf32, #tpu.memory_space<vmem>>, vector<16x256xf32>
    tpu.vector_store %arg4[%c0_4, %c0_5], %7 {strides = array<i32>} : memref<16x256xf32, #tpu.memory_space<vmem>>, vector<16x256xf32>,
    return
  }
  func.func @transform_0(%arg0: i32, %arg1: i32) -> (i32, i32) {
    %c0_i32 = arith.constant 0 : i32
    return %arg1, %arg0 : i32, i32
  }
  func.func @transform_1(%arg0: i32, %arg1: i32) -> (i32, i32) {
    %c1_i32 = arith.constant 1 : i32
    %0 = arith.addi %arg0, %c1_i32 : i32
    %c0_i32 = arith.constant 0 : i32
    return %arg1, %0 : i32, i32
  }
  func.func @transform_2(%arg0: i32, %arg1: i32) -> (i32, i32) {
    %c0_i32 = arith.constant 0 : i32
    return %arg1, %arg0 : i32, i32
  }
}

</mosaic_0001>

<bundles_post_ra>
// kernel: tpu_custom_call.1
= control target key start
LH: loop header
LB: loop body
LE: loop exit
PB: predicated region body
PF: predicated region fallthrough
CT: control target
= control target key end

     0   :  { %7 = vsyncpa [#allocation3], 0  ;;  %s241_s0 = inlined_call_operand.hbm [shape: f32[16,512], index: 0, kind: input, shape index: {}]   ;;  %s242_s1 = inlined_call_operand.hbm [shape: f32[16,512], index: 1, kind: input, shape index: {}]   ;;  %s243_s2 = inlined_call_operand.hbm [shape: f32[16,256], index: 2, kind: output, shape index: {}]  }
   0x1   :  { %8 = vsyncpa [#allocation6], 0 }
   0x2   :  { %9 = vsyncpa [#allocation4], 0  ;;  %s174_s9 = smov [#allocation2]   ;;  %s99_s13 = scalar_lea.hbm %s241_s0, 512 }
   0x3   :  { %s15_s10 = sshll.u32 %s174_s9, 4  ;;  %p100_p0 = scmp.ne.s32.totalorder %s241_s0, %s99_s13  ;;  %s16_s10 = int_to_ptr.vmem [resolvable:$true] %s15_s10 }
   0x4   :  { %s101_s18 = scalar_lea.hbm %s241_s0, 1024  ;;  %p103_p2 = scmp.lt.u32.totalorder %s99_s13, %s241_s0 }
   0x5   :  { %p102_p1 = scmp.lt.u32.totalorder %s101_s18, %s99_s13 }
   0x7   :  { %p104_p3 = por %p103_p2, %p102_p1 }
   0x9   :  { %p105_p4 = pnand %p104_p3, %p100_p0 }
   0xb   :  { %108 = shalt.err (!%p105_p4)
}
   0xc   :  { %s109_s21 = scalar_lea.vmem %s16_s10, 512  ;;  %p114_p6 = scmp.lt.s32.totalorder %s16_s10, %s16_s10 }
   0xd   :  { %p110_p5 = scmp.ne.s32.totalorder %s16_s10, %s109_s21  ;;  %p115_p7 = scmp.lt.s32.totalorder %s109_s21, %s109_s21 }
   0xf   :  { %p116_p8 = por %p115_p7, %p114_p6 }
  0x11   :  { %p117_p9 = pnand %p116_p8, %p110_p5 }
  0x13   :  { %120 = shalt.err (!%p117_p9)
}
  0x14   :  { %s175_s22 = smov 512   ;;  %s176_s23 = smov 256  }
  0x15   :  { %s177_s24 = smov 16   ;;  %s92_s29 = scalar_lea.hbm %s242_s1, 256 }
  0x16   :  { %21 = dma.hbm_to_vmem [thread:$0]  %s241_s0, 512, %s16_s10, [#allocation3], %s175_s22, %s176_s23, %s177_s24  }
  0x17   :  { %s178_s30 = smov [#allocation5]   ;;  %s145_s6 = scalar_lea.hbm %s242_s1, 768 }
  0x18   :  { %s31_s3 = sshll.u32 %s178_s30, 4  ;;  %p122_p10 = scmp.ne.s32.totalorder %s92_s29, %s145_s6  ;;  %s32_s3 = int_to_ptr.vmem [resolvable:$true] %s31_s3 }
  0x19   :  { %s123_s9 = scalar_lea.hbm %s242_s1, 1024  ;;  %p124_p11 = scmp.lt.u32.totalorder %s92_s29, %s242_s1 }
  0x1a   :  { %p125_p12 = scmp.lt.u32.totalorder %s123_s9, %s145_s6  ;;  %p127_p0 = scmp.lt.u32.totalorder %s145_s6, %s92_s29 }
  0x1c   :  { %p126_p13 = por %p125_p12, %p124_p11 }
  0x1e   :  { %p128_p1 = por %p127_p0, %p126_p13 }
  0x20   :  { %p129_p2 = pnand %p128_p1, %p122_p10 }
  0x22   :  { %132 = shalt.err (!%p129_p2)
}
  0x23   :  { %s133_s0 = scalar_lea.vmem %s32_s3, 512  ;;  %p138_p4 = scmp.lt.s32.totalorder %s32_s3, %s32_s3 }
  0x24   :  { %p134_p3 = scmp.ne.s32.totalorder %s32_s3, %s133_s0  ;;  %p139_p5 = scmp.lt.s32.totalorder %s133_s0, %s133_s0 }
  0x26   :  { %p140_p6 = por %p139_p5, %p138_p4 }
  0x28   :  { %p141_p7 = pnand %p140_p6, %p134_p3 }
  0x2a   :  { %144 = shalt.err (!%p141_p7)
}
  0x2b   :  { %37 = dma.hbm_to_vmem [thread:$0]  %s92_s29, 512, %s32_s3, [#allocation6], %s175_s22, %s176_s23, %s177_s24  }
  0x2c   :  { %168 = dma.done.wait [#allocation3], 512  }
  0x2d   :  { %169 = vsyncadd [#allocation3], 4294966784 }
  0x2e   :  { %170 = dma.done.wait [#allocation6], 512  }
  0x2f   :  { %171 = vsyncadd [#allocation6], 4294966784  ;;  %v46_v0 = vld [vmem:[#allocation2] sm:$0xff]  ;;  %v47_v2 = vld [vmem:[#allocation2 + $0x8] sm:$0xff]  ;;  %s179_s1 = smov [#allocation7]  }
  0x30   :  { %v50_v1 = vld [vmem:[#allocation5] sm:$0xff]  ;;  %v54_v3 = vmax.f32 %v46_v0, 0.0  ;;  %v51_v4 = vld [vmem:[#allocation5 + $0x8] sm:$0xff]  ;;  %v55_v5 = vmax.f32 %v47_v2, 0.0  ;;  %v48_v6 = vld [vmem:[#allocation2 + $0x10] sm:$0xff]  ;;  %s79_s10 = sshll.u32 %s179_s1, 4  ;;  %s80_s10 = int_to_ptr.vmem [resolvable:$true] %s79_s10 }
  0x31   :  { %v52_v7 = vld [vmem:[#allocation5 + $0x10] sm:$0xff]  ;;  %v56_v8 = vmax.f32 %v48_v6, 0.0  ;;  %v49_v9 = vld [vmem:[#allocation2 + $0x18] sm:$0xff]  ;;  %s146_s13 = scalar_lea.vmem %s80_s10, 512  ;;  %p151_p9 = scmp.lt.s32.totalorder %s80_s10, %s80_s10 }
  0x32   :  { %v58_v10 = vmin.f32 %v50_v1, %v54_v3  ;;  %v62_v11 = vsub.f32 0.0, %v54_v3  ;;  %v59_v12 = vmin.f32 %v51_v4, %v55_v5  ;;  %v63_v13 = vsub.f32 0.0, %v55_v5  ;;  %v53_v14 = vld [vmem:[#allocation5 + $0x18] sm:$0xff]  ;;  %p147_p8 = scmp.ne.s32.totalorder %s80_s10, %s146_s13  ;;  %p152_p10 = scmp.lt.s32.totalorder %s146_s13, %s146_s13 }
  0x33   :  { %v60_v15 = vmin.f32 %v52_v7, %v56_v8  ;;  %v64_v16 = vsub.f32 0.0, %v56_v8  ;;  %v57_v17 = vmax.f32 %v49_v9, 0.0 }
  0x34   :  { %v66_v18 = vmax.f32 %v58_v10, %v62_v11  ;;  %v67_v19 = vmax.f32 %v59_v12, %v63_v13  ;;  %p153_p11 = por %p152_p10, %p151_p9 }
  0x35   :  { %v68_v20 = vmax.f32 %v60_v15, %v64_v16  ;;  %v61_v21 = vmin.f32 %v53_v14, %v57_v17  ;;  %v65_v22 = vsub.f32 0.0, %v57_v17 }
  0x36   :  { %70 = vst [vmem:[#allocation7] sm:$0xff] %v66_v18  ;;  %71 = vst [vmem:[#allocation7 + $0x8] sm:$0xff] %v67_v19  ;;  %p154_p12 = pnand %p153_p11, %p147_p8 }
  0x37   :  { %72 = vst [vmem:[#allocation7 + $0x10] sm:$0xff] %v68_v20  ;;  %v69_v23 = vmax.f32 %v61_v21, %v65_v22 }
  0x39   :  { %73 = vst [vmem:[#allocation7 + $0x18] sm:$0xff] %v69_v23 }
  0x3a   :  { %157 = shalt.err (!%p154_p12)
}
  0x3b   :  { %s158_s16 = scalar_lea.hbm %s243_s2, 512 }
  0x3c   :  { %p159_p13 = scmp.ne.s32.totalorder %s243_s2, %s158_s16  ;;  %p162_p0 = scmp.lt.u32.totalorder %s158_s16, %s243_s2 }
  0x3e   :  { %p164_p1 = pnand %p162_p0, %p159_p13 }
  0x40   :  { %167 = shalt.err (!%p164_p1)
}
  0x41   :  { %85 = dma.vmem_to_hbm [thread:$0]  %s80_s10, 512, %s243_s2, [#allocation4], %s176_s23, %s176_s23, %s177_s24  }
  0x42   :  { %172 = dma.done.wait [#allocation4], 512  }
  0x43   :  { %173 = vsyncadd [#allocation4], 4294966784 }
  0x44   :  { %89 = vsyncpa [#allocation3], 1 }
  0x45   :  { %90 = vsyncpa [#allocation6], 1 }
  0x46   :  { %91 = vsyncpa [#allocation4], 1 }

</bundles_post_ra>
